<compile_context>
chip_gen: v7x
topology: tpu7x:2x2x1
jax: 0.10.0
libtpu: 0.0.40
codegen_flags: <defaults>
</compile_context>

<pallas_src>
import operator
from functools import reduce

import jax
import jax.numpy as jnp
from jax.experimental import pallas as pl
from jax.experimental.pallas import tpu as pltpu


def _round_up(x: int, m: int) -> int:
    return ((x + m - 1) // m) * m


def _make_kernel(num_hidden: int, negative_slope: float = 0.2):
    n_layers = num_hidden + 1

    def kernel(*args):
        # args = x_ref, (W_0, b_0, ..., W_L, b_L), o_ref
        x_ref = args[0]
        wb = args[1:1 + 2 * n_layers]
        o_ref = args[1 + 2 * n_layers]

        # In-kernel bf16 cast of the f32 input tile (VPU has huge slack; the
        # kernel is DMA-bound, so this is free and halves HBM traffic on x).
        act = x_ref[...].astype(jnp.bfloat16)                 # [TB, F]
        for li in range(n_layers):
            w_ref = wb[2 * li]
            b_ref = wb[2 * li + 1]
            # bf16 MXU matmul, f32 accumulation.
            y = jnp.dot(act, w_ref[...], preferred_element_type=jnp.float32)
            y = y + b_ref[...].astype(jnp.float32)            # [TB, H_pad] f32
            if li < num_hidden:
                # LeakyReLU(0.2) on the f32 accumulator; keep activation in
                # vregs (no scratch VMEM round-trip).
                y = jnp.where(y >= 0, y, jnp.float32(negative_slope) * y)
                act = y.astype(jnp.bfloat16)
            else:
                # Final layer: only lane 0 is real (out_dim == 1). Sigmoid on
                # that single column, store as a narrow [TB, 1] f32 block.
                o_ref[...] = jax.nn.sigmoid(y[:, :1]).astype(o_ref.dtype)

    return kernel


def prepare_discriminator_params(weights, biases):
    """Pad/cast weights & biases ONCE (hoisted out of the forward path).

    weights[i]: [in_dim, out_dim] (already transposed vs. PyTorch's [out, in],
                so y = x @ W + b matches nn.Linear). Last layer out_dim == 1.
    biases[i]:  [out_dim].

    Layer 0 keeps its raw K (= flattened image size, unpadded, to match the
    unpadded x); all out dims (and subsequent in dims) are padded to 128 with
    zeros, which keeps results exact.
    """
    prepped = []
    for li, (w, b) in enumerate(zip(weights, biases)):
        d_in, d_out = w.shape
        in_pad = d_in if li == 0 else _round_up(d_in, 128)
        out_pad = _round_up(d_out, 128)
        wp = jnp.zeros((in_pad, out_pad), jnp.bfloat16)
        wp = wp.at[:d_in, :d_out].set(w.astype(jnp.bfloat16))
        bp = jnp.zeros((1, out_pad), jnp.bfloat16)
        bp = bp.at[0, :d_out].set(b.astype(jnp.bfloat16))
        prepped.append((wp, bp))
    return tuple(prepped)


def _pick_vmem_limit() -> int:
    """Scoped VMEM limit: ~96 MiB on v5e/v6e (128 MiB phys), ~48 MiB on v7x."""
    cap = 128 * 1024 * 1024
    try:
        info = pltpu.get_tpu_info()
        cap = int(getattr(info, "vmem_capacity_bytes", cap))
    except Exception:
        pass
    return min(96 * 1024 * 1024, (cap * 3) // 4)


def discriminator_forward(image, params, *, max_block_batch: int = 2048,
                          vmem_limit_bytes: int | None = None):
    """Fused Discriminator forward. Returns [B, 1] float32."""
    B = image.shape[0]
    x = image.reshape(B, -1)                 # native dtype, no pad/cast pre-pass
    F = x.shape[1]
    n_layers = len(params)
    num_hidden = n_layers - 1

    if vmem_limit_bytes is None:
        vmem_limit_bytes = _pick_vmem_limit()

    # --- batch-tile sizing from the VMEM budget -----------------------------
    # Conservative accounting: x tile double-buffered at its native itemsize,
    # weights/biases double-buffered (default pipelining; their grid-invariant
    # index_map means Mosaic only DMAs them once, but budget 2x to be safe).
    weight_bytes = 2 * sum(int(w.size) * w.dtype.itemsize +
                           int(b.size) * b.dtype.itemsize for (w, b) in params)
    x_row_bytes = 2 * F * x.dtype.itemsize
    budget = vmem_limit_bytes - weight_bytes - (4 << 20)   # headroom
    tb_budget = max(8, (budget // max(x_row_bytes, 1)) // 8 * 8)
    tb_budget = min(tb_budget, max_block_batch)

    if B <= tb_budget:
        if B >= 16:
            # Split into >= 2 grid steps so "parallel" shards across the two
            # v7x TensorCores (no-op on single-TC v5e/v6e).
            TB = min(tb_budget, _round_up(pl.cdiv(B, 2), 8))
        else:
            TB = B                       # block == full batch dim -> always legal
    else:
        TB = tb_budget                   # multiple of 8; last block may be ragged
    grid = (pl.cdiv(B, TB),)
    # Ragged last block: OOB input rows are undefined but feed only OOB output
    # rows, whose writes Pallas masks; each batch row is independent.

    # --- specs ---------------------------------------------------------------
    # x pipelined over the batch axis; weights/biases resident (full-array
    # block, grid-invariant index_map -> fetched once, kept in VMEM).
    in_specs = [pl.BlockSpec((TB, F), lambda i: (i, 0))]
    operands = [x]
    for (w, b) in params:
        in_specs.append(pl.BlockSpec(w.shape, lambda i: (0, 0)))
        in_specs.append(pl.BlockSpec(b.shape, lambda i: (0, 0)))
        operands.append(w)
        operands.append(b)

    out_specs = pl.BlockSpec((TB, 1), lambda i: (i, 0))     # narrow writeback
    out_shape = jax.ShapeDtypeStruct((B, 1), jnp.float32)

    return pl.pallas_call(
        _make_kernel(num_hidden),
        out_shape=out_shape,
        grid=grid,
        in_specs=in_specs,
        out_specs=out_specs,
        compiler_params=pltpu.CompilerParams(
            dimension_semantics=("parallel",),
            vmem_limit_bytes=int(vmem_limit_bytes),
        ),
    )(*operands)


def discriminator_reference(image, weights, biases, negative_slope: float = 0.2):
    """Pure-JAX f32 reference mirroring the PyTorch forward."""
    B = image.shape[0]
    x = image.reshape(B, -1).astype(jnp.float32)
    n = len(weights)
    for li in range(n):
        x = x @ weights[li].astype(jnp.float32) + biases[li].astype(jnp.float32)
        if li < n - 1:
            x = jnp.where(x >= 0, x, negative_slope * x)
    return jax.nn.sigmoid(x)


if __name__ == "__main__":
    key = jax.random.PRNGKey(0)

    # Small shapes consistent with the module: Discriminator((4,16,16), (64,32))
    B, C, H, W = 2, 4, 16, 16
    im_size = (C, H, W)
    hidden_dim = (64, 32)

    im_flat = reduce(operator.mul, im_size, 1)
    dims = [im_flat] + list(hidden_dim) + [1]

    keys = jax.random.split(key, 1 + 2 * (len(dims) - 1))
    image = jax.random.normal(keys[0], (B, C, H, W), jnp.float32)

    weights, biases = [], []
    for li, (d_in, d_out) in enumerate(zip(dims[:-1], dims[1:])):
        bound = 1.0 / (d_in ** 0.5)
        w = jax.random.uniform(keys[1 + 2 * li], (d_in, d_out), jnp.float32,
                               -bound, bound)
        b = jax.random.uniform(keys[2 + 2 * li], (d_out,), jnp.float32,
                               -bound, bound)
        weights.append(w)
        biases.append(b)

    params = prepare_discriminator_params(weights, biases)   # hoisted, once
    out = discriminator_forward(image, params)
    out = jax.block_until_ready(out)

    assert out.shape == (B, 1), f"unexpected output shape {out.shape}"
    ref = discriminator_reference(image, weights, biases)
    max_err = float(jnp.max(jnp.abs(out - ref)))
    assert max_err < 5e-2, f"max abs error {max_err} vs f32 reference"

    print("KERNEL_OK")
</pallas_src>

<mosaic_0001>
module attributes {stable_mosaic.version = 11 : i64} {
  func.func @kernel(%arg0: i32, %arg1: memref<2x1024xf32, #tpu.memory_space<vmem>>, %arg2: memref<1024x128xbf16, #tpu.memory_space<vmem>>, %arg3: memref<1x128xbf16, #tpu.memory_space<vmem>>, %arg4: memref<128x128xbf16, #tpu.memory_space<vmem>>, %arg5: memref<1x128xbf16, #tpu.memory_space<vmem>>, %arg6: memref<128x128xbf16, #tpu.memory_space<vmem>>, %arg7: memref<1x128xbf16, #tpu.memory_space<vmem>>, %arg8: memref<2x1xf32, #tpu.memory_space<vmem>>) attributes {dimension_semantics = [#tpu.dimension_semantics<parallel>], iteration_bounds = array<i64: 1>, scalar_prefetch = 0 : i64, scratch_operands = 0 : i64, tpu.core_type = #tpu.core_type<tc>, window_params = [{transform_indices = @transform_0, window_bounds = array<i64: 2, 1024>}, {pipeline_mode = #tpu.pipeline_mode<synchronous>, transform_indices = @transform_1, window_bounds = array<i64: 1024, 128>}, {pipeline_mode = #tpu.pipeline_mode<synchronous>, transform_indices = @transform_2, window_bounds = array<i64: 1, 128>}, {pipeline_mode = #tpu.pipeline_mode<synchronous>, transform_indices = @transform_3, window_bounds = array<i64: 128, 128>}, {pipeline_mode = #tpu.pipeline_mode<synchronous>, transform_indices = @transform_4, window_bounds = array<i64: 1, 128>}, {pipeline_mode = #tpu.pipeline_mode<synchronous>, transform_indices = @transform_5, window_bounds = array<i64: 128, 128>}, {pipeline_mode = #tpu.pipeline_mode<synchronous>, transform_indices = @transform_6, window_bounds = array<i64: 1, 128>}, {transform_indices = @transform_7, window_bounds = array<i64: 2, 1>}]} {
    %c0 = arith.constant 0 : index
    %c0_0 = arith.constant 0 : index
    %0 = vector.load %arg1[%c0, %c0_0] : memref<2x1024xf32, #tpu.memory_space<vmem>>, vector<2x1024xf32>
    %1 = arith.truncf %0 : vector<2x1024xf32> to vector<2x1024xbf16>
    %c0_1 = arith.constant 0 : index
    %c0_2 = arith.constant 0 : index
    %2 = vector.load %arg2[%c0_1, %c0_2] : memref<1024x128xbf16, #tpu.memory_space<vmem>>, vector<1024x128xbf16>
    %cst = arith.constant dense<0.000000e+00> : vector<2x128xf32>
    %3 = tpu.matmul %1, %2, %cst {dimension_numbers = #tpu.dot_dimension_numbers<[1], [0], [0], [1], [0, 0, 1, 1], [], []>} : vector<2x1024xbf16>, vector<1024x128xbf16>, vector<2x128xf32> -> vector<2x128xf32>
    %c0_3 = arith.constant 0 : index
    %c0_4 = arith.constant 0 : index
    %4 = vector.load %arg3[%c0_3, %c0_4] : memref<1x128xbf16, #tpu.memory_space<vmem>>, vector<1x128xbf16>
    %5 = arith.extf %4 : vector<1x128xbf16> to vector<1x128xf32>
    %6 = vector.broadcast %5 : vector<1x128xf32> to vector<2x128xf32>
    %7 = arith.addf %3, %6 : vector<2x128xf32>
    %cst_5 = arith.constant 0.000000e+00 : f32
    %8 = vector.broadcast %cst_5 : f32 to vector<2x128xf32>
    %9 = arith.cmpf oge, %7, %8 : vector<2x128xf32>
    %cst_6 = arith.constant 2.000000e-01 : f32
    %10 = vector.broadcast %cst_6 : f32 to vector<2x128xf32>
    %11 = arith.mulf %10, %7 : vector<2x128xf32>
    %12 = arith.select %9, %7, %11 : vector<2x128xi1>, vector<2x128xf32>
    %13 = arith.truncf %12 : vector<2x128xf32> to vector<2x128xbf16>
    %c0_7 = arith.constant 0 : index
    %c0_8 = arith.constant 0 : index
    %14 = vector.load %arg4[%c0_7, %c0_8] : memref<128x128xbf16, #tpu.memory_space<vmem>>, vector<128x128xbf16>
    %cst_9 = arith.constant dense<0.000000e+00> : vector<2x128xf32>
    %15 = tpu.matmul %13, %14, %cst_9 {dimension_numbers = #tpu.dot_dimension_numbers<[1], [0], [0], [1], [0, 0, 1, 1], [], []>} : vector<2x128xbf16>, vector<128x128xbf16>, vector<2x128xf32> -> vector<2x128xf32>
    %c0_10 = arith.constant 0 : index
    %c0_11 = arith.constant 0 : index
    %16 = vector.load %arg5[%c0_10, %c0_11] : memref<1x128xbf16, #tpu.memory_space<vmem>>, vector<1x128xbf16>
    %17 = arith.extf %16 : vector<1x128xbf16> to vector<1x128xf32>
    %18 = vector.broadcast %17 : vector<1x128xf32> to vector<2x128xf32>
    %19 = arith.addf %15, %18 : vector<2x128xf32>
    %cst_12 = arith.constant 0.000000e+00 : f32
    %20 = vector.broadcast %cst_12 : f32 to vector<2x128xf32>
    %21 = arith.cmpf oge, %19, %20 : vector<2x128xf32>
    %cst_13 = arith.constant 2.000000e-01 : f32
    %22 = vector.broadcast %cst_13 : f32 to vector<2x128xf32>
    %23 = arith.mulf %22, %19 : vector<2x128xf32>
    %24 = arith.select %21, %19, %23 : vector<2x128xi1>, vector<2x128xf32>
    %25 = arith.truncf %24 : vector<2x128xf32> to vector<2x128xbf16>
    %c0_14 = arith.constant 0 : index
    %c0_15 = arith.constant 0 : index
    %26 = vector.load %arg6[%c0_14, %c0_15] : memref<128x128xbf16, #tpu.memory_space<vmem>>, vector<128x128xbf16>
    %cst_16 = arith.constant dense<0.000000e+00> : vector<2x128xf32>
    %27 = tpu.matmul %25, %26, %cst_16 {dimension_numbers = #tpu.dot_dimension_numbers<[1], [0], [0], [1], [0, 0, 1, 1], [], []>} : vector<2x128xbf16>, vector<128x128xbf16>, vector<2x128xf32> -> vector<2x128xf32>
    %c0_17 = arith.constant 0 : index
    %c0_18 = arith.constant 0 : index
    %28 = vector.load %arg7[%c0_17, %c0_18] : memref<1x128xbf16, #tpu.memory_space<vmem>>, vector<1x128xbf16>
    %29 = arith.extf %28 : vector<1x128xbf16> to vector<1x128xf32>
    %30 = vector.broadcast %29 : vector<1x128xf32> to vector<2x128xf32>
    %31 = arith.addf %27, %30 : vector<2x128xf32>
    %32 = vector.extract_strided_slice %31 {offsets = [0, 0], sizes = [2, 1], strides = [1, 1]} : vector<2x128xf32> to vector<2x1xf32>
    %33 = arith.negf %32 : vector<2x1xf32>
    %34 = math.exp %33 : vector<2x1xf32>
    %cst_19 = arith.constant 1.000000e+00 : f32
    %35 = vector.broadcast %cst_19 : f32 to vector<2x1xf32>
    %36 = arith.addf %35, %34 : vector<2x1xf32>
    %37 = arith.divf %35, %36 : vector<2x1xf32>
    %c0_20 = arith.constant 0 : index
    %c0_21 = arith.constant 0 : index
    %38 = vector.load %arg8[%c0_20, %c0_21] : memref<2x1xf32, #tpu.memory_space<vmem>>, vector<2x1xf32>
    tpu.vector_store %arg8[%c0_20, %c0_21], %37 {strides = array<i32>} : memref<2x1xf32, #tpu.memory_space<vmem>>, vector<2x1xf32>,
    return
  }
  func.func @transform_0(%arg0: i32) -> (i32, i32) {
    %c0_i32 = arith.constant 0 : i32
    %c0_i32_0 = arith.constant 0 : i32
    return %arg0, %c0_i32 : i32, i32
  }
  func.func @transform_1(%arg0: i32) -> (i32, i32) {
    %c0_i32 = arith.constant 0 : i32
    %c0_i32_0 = arith.constant 0 : i32
    %c0_i32_1 = arith.constant 0 : i32
    return %c0_i32, %c0_i32_0 : i32, i32
  }
  func.func @transform_2(%arg0: i32) -> (i32, i32) {
    %c0_i32 = arith.constant 0 : i32
    %c0_i32_0 = arith.constant 0 : i32
    %c0_i32_1 = arith.constant 0 : i32
    return %c0_i32, %c0_i32_0 : i32, i32
  }
  func.func @transform_3(%arg0: i32) -> (i32, i32) {
    %c0_i32 = arith.constant 0 : i32
    %c0_i32_0 = arith.constant 0 : i32
    %c0_i32_1 = arith.constant 0 : i32
    return %c0_i32, %c0_i32_0 : i32, i32
  }
  func.func @transform_4(%arg0: i32) -> (i32, i32) {
    %c0_i32 = arith.constant 0 : i32
    %c0_i32_0 = arith.constant 0 : i32
    %c0_i32_1 = arith.constant 0 : i32
    return %c0_i32, %c0_i32_0 : i32, i32
  }
  func.func @transform_5(%arg0: i32) -> (i32, i32) {
    %c0_i32 = arith.constant 0 : i32
    %c0_i32_0 = arith.constant 0 : i32
    %c0_i32_1 = arith.constant 0 : i32
    return %c0_i32, %c0_i32_0 : i32, i32
  }
  func.func @transform_6(%arg0: i32) -> (i32, i32) {
    %c0_i32 = arith.constant 0 : i32
    %c0_i32_0 = arith.constant 0 : i32
    %c0_i32_1 = arith.constant 0 : i32
    return %c0_i32, %c0_i32_0 : i32, i32
  }
  func.func @transform_7(%arg0: i32) -> (i32, i32) {
    %c0_i32 = arith.constant 0 : i32
    %c0_i32_0 = arith.constant 0 : i32
    return %arg0, %c0_i32 : i32, i32
  }
}

</mosaic_0001>

<bundles_post_ra>
// kernel: tpu_custom_call.1
= control target key start
LH: loop header
LB: loop body
LE: loop exit
PB: predicated region body
PF: predicated region fallthrough
CT: control target
= control target key end

     0   :  { %12 = vsyncpa [#allocation3], 0  ;;  %s1799_s0 = inlined_call_operand.hbm [shape: f32[2,1024], index: 0, kind: input, shape index: {}]   ;;  %s1800_s1 = inlined_call_operand.hbm [shape: bf16[1024,128], index: 1, kind: input, shape index: {}]   ;;  %s1801_s2 = inlined_call_operand.hbm [shape: bf16[1,128], index: 2, kind: input, shape index: {}]   ;;  %s1802_s3 = inlined_call_operand.hbm [shape: bf16[128,128], index: 3, kind: input, shape index: {}]   ;;  %s1803_s4 = inlined_call_operand.hbm [shape: bf16[1,128], index: 4, kind: input, shape index: {}]   ;;  %s1804_s5 = inlined_call_operand.hbm [shape: bf16[128,128], index: 5, kind: input, shape index: {}]   ;;  %s1805_s6 = inlined_call_operand.hbm [shape: bf16[1,128], index: 6, kind: input, shape index: {}]   ;;  %s1806_s7 = inlined_call_operand.hbm [shape: f32[2,1], index: 7, kind: output, shape index: {}]  }
   0x1   :  { %13 = vsyncpa [#allocation6], 0 }
   0x2   :  { %14 = vsyncpa [#allocation9], 0 }
   0x3   :  { %15 = vsyncpa [#allocation12], 0 }
   0x4   :  { %16 = vsyncpa [#allocation4], 0  ;;  %s1613_s24 = smov [#allocation5]   ;;  %s1427_s28 = scalar_lea.hbm %s1800_s1, 8192 }
   0x5   :  { %s32_s25 = sshll.u32 %s1613_s24, 4  ;;  %p1428_p0 = scmp.ne.s32.totalorder %s1800_s1, %s1427_s28  ;;  %s33_s25 = int_to_ptr.vmem [resolvable:$true] %s32_s25 }
   0x6   :  { %p1431_p1 = scmp.lt.u32.totalorder %s1427_s28, %s1800_s1 }
   0x8   :  { %p1433_p2 = pnand %p1431_p1, %p1428_p0 }
   0xa   :  { %1436 = shalt.err (!%p1433_p2)
}
   0xb   :  { %s1437_s10 = scalar_lea.vmem %s33_s25, 8192  ;;  %p1442_p4 = scmp.lt.s32.totalorder %s33_s25, %s33_s25 }
   0xc   :  { %p1438_p3 = scmp.ne.s32.totalorder %s33_s25, %s1437_s10  ;;  %p1443_p5 = scmp.lt.s32.totalorder %s1437_s10, %s1437_s10 }
   0xe   :  { %p1444_p6 = por %p1443_p5, %p1442_p4 }
  0x10   :  { %p1445_p7 = pnand %p1444_p6, %p1438_p3 }
  0x12   :  { %1448 = shalt.err (!%p1445_p7)
}
  0x13   :  { %s1614_s11 = smov 64   ;;  %s1615_s12 = smov 4  }
  0x14   :  { %38 = dma.hbm_to_vmem [thread:$0]  %s1800_s1, 8192, %s33_s25, [#allocation6], %s1614_s11, %s1614_s11, %s1615_s12  }
  0x15   :  { %s1616_s15 = smov [#allocation8]   ;;  %s1617_s17 = smov [#allocation11]  }
  0x16   :  { %s54_s16 = sshll.u32 %s1616_s15, 4  ;;  %s76_s18 = sshll.u32 %s1617_s17, 4  ;;  %s55_s16 = int_to_ptr.vmem [resolvable:$true] %s54_s16  ;;  %s77_s18 = int_to_ptr.vmem [resolvable:$true] %s76_s18 }
  0x17   :  { %s1449_s21 = scalar_lea.hbm %s1802_s3, 1024 }
  0x18   :  { %p1450_p8 = scmp.ne.s32.totalorder %s1802_s3, %s1449_s21  ;;  %p1453_p9 = scmp.lt.u32.totalorder %s1449_s21, %s1802_s3 }
  0x1a   :  { %p1455_p10 = pnand %p1453_p9, %p1450_p8 }
  0x1c   :  { %1458 = shalt.err (!%p1455_p10)
}
  0x1d   :  { %s1459_s1 = scalar_lea.vmem %s55_s16, 1024  ;;  %p1464_p12 = scmp.lt.s32.totalorder %s55_s16, %s55_s16 }
  0x1e   :  { %p1460_p11 = scmp.ne.s32.totalorder %s55_s16, %s1459_s1  ;;  %p1465_p13 = scmp.lt.s32.totalorder %s1459_s1, %s1459_s1 }
  0x20   :  { %p1466_p0 = por %p1465_p13, %p1464_p12 }
  0x22   :  { %p1467_p1 = pnand %p1466_p0, %p1460_p11 }
  0x24   :  { %1470 = shalt.err (!%p1467_p1)
}
  0x25   :  { %60 = dma.hbm_to_vmem [thread:$0]  %s1802_s3, 1024, %s55_s16, [#allocation9], %s1614_s11, %s1614_s11, %s1615_s12  }
  0x26   :  { %s1471_s30 = scalar_lea.hbm %s1804_s5, 1024 }
  0x27   :  { %p1472_p2 = scmp.ne.s32.totalorder %s1804_s5, %s1471_s30  ;;  %p1475_p3 = scmp.lt.u32.totalorder %s1471_s30, %s1804_s5 }
  0x29   :  { %p1477_p4 = pnand %p1475_p3, %p1472_p2 }
  0x2b   :  { %1480 = shalt.err (!%p1477_p4)
}
  0x2c   :  { %s1481_s14 = scalar_lea.vmem %s77_s18, 1024  ;;  %p1486_p6 = scmp.lt.s32.totalorder %s77_s18, %s77_s18 }
  0x2d   :  { %p1482_p5 = scmp.ne.s32.totalorder %s77_s18, %s1481_s14  ;;  %p1487_p7 = scmp.lt.s32.totalorder %s1481_s14, %s1481_s14 }
  0x2f   :  { %p1488_p8 = por %p1487_p7, %p1486_p6 }
  0x31   :  { %p1489_p9 = pnand %p1488_p8, %p1482_p5 }
  0x33   :  { %1492 = shalt.err (!%p1489_p9)
}
  0x34   :  { %82 = dma.hbm_to_vmem [thread:$0]  %s1804_s5, 1024, %s77_s18, [#allocation12], %s1614_s11, %s1614_s11, %s1615_s12  }
  0x35   :  { %s1618_s16 = smov [#allocation2]   ;;  %s1619_s19 = smov [#allocation7]  }
  0x36   :  { %s23_s17 = sshll.u32 %s1618_s16, 4  ;;  %s45_s20 = sshll.u32 %s1619_s19, 4  ;;  %s24_s17 = int_to_ptr.vmem [resolvable:$true] %s23_s17  ;;  %s46_s20 = int_to_ptr.vmem [resolvable:$true] %s45_s20 }
  0x37   :  { %s1493_s23 = scalar_lea.hbm %s1799_s0, 256 }
  0x38   :  { %p1494_p10 = scmp.ne.s32.totalorder %s1799_s0, %s1493_s23  ;;  %p1497_p11 = scmp.lt.u32.totalorder %s1493_s23, %s1799_s0 }
  0x3a   :  { %p1499_p12 = pnand %p1497_p11, %p1494_p10 }
  0x3c   :  { %1502 = shalt.err (!%p1499_p12)
}
  0x3d   :  { %s1503_s5 = scalar_lea.vmem %s24_s17, 256  ;;  %p1508_p0 = scmp.lt.s32.totalorder %s24_s17, %s24_s17 }
  0x3e   :  { %p1504_p13 = scmp.ne.s32.totalorder %s24_s17, %s1503_s5  ;;  %p1509_p1 = scmp.lt.s32.totalorder %s1503_s5, %s1503_s5 }
  0x40   :  { %p1510_p2 = por %p1509_p1, %p1508_p0 }
  0x42   :  { %p1511_p3 = pnand %p1510_p2, %p1504_p13 }
  0x44   :  { %1514 = shalt.err (!%p1511_p3)
}
  0x45   :  { %26 = dma.hbm_to_vmem [thread:$0]  %s1799_s0, 256, %s24_s17, [#allocation3]  }
  0x46   :  { %s1515_s28 = scalar_lea.hbm %s1801_s2, 16 }
  0x47   :  { %p1516_p4 = scmp.ne.s32.totalorder %s1801_s2, %s1515_s28  ;;  %p1519_p5 = scmp.lt.u32.totalorder %s1515_s28, %s1801_s2 }
  0x49   :  { %p1521_p6 = pnand %p1519_p5, %p1516_p4 }
  0x4b   :  { %1524 = shalt.err (!%p1521_p6)
}
  0x4c   :  { %s1525_s10 = scalar_lea.vmem %s46_s20, 16  ;;  %s1529_s13 = scalar_lea.vmem %s46_s20, 32 }
  0x4d   :  { %p1526_p7 = scmp.ne.s32.totalorder %s46_s20, %s1525_s10  ;;  %p1530_p8 = scmp.lt.s32.totalorder %s46_s20, %s46_s20 }
  0x4e   :  { %p1531_p9 = scmp.lt.s32.totalorder %s1529_s13, %s1525_s10 }
  0x50   :  { %p1532_p10 = por %p1531_p9, %p1530_p8 }
  0x52   :  { %p1533_p11 = pnand %p1532_p10, %p1526_p7 }
  0x54   :  { %1536 = shalt.err (!%p1533_p11)
}
  0x55   :  { %48 = dma.hbm_to_vmem [thread:$0]  %s1801_s2, 16, %s46_s20, [#allocation6]  }
  0x56   :  { %s1620_s3 = smov [#allocation10]   ;;  %s1621_s16 = smov [#allocation13]  }
  0x57   :  { %s67_s15 = sshll.u32 %s1620_s3, 4  ;;  %s89_s17 = sshll.u32 %s1621_s16, 4  ;;  %s68_s15 = int_to_ptr.vmem [resolvable:$true] %s67_s15  ;;  %s90_s17 = int_to_ptr.vmem [resolvable:$true] %s89_s17 }
  0x58   :  { %s1537_s22 = scalar_lea.hbm %s1803_s4, 16 }
  0x59   :  { %p1538_p12 = scmp.ne.s32.totalorder %s1803_s4, %s1537_s22  ;;  %p1541_p13 = scmp.lt.u32.totalorder %s1537_s22, %s1803_s4 }
  0x5b   :  { %p1543_p0 = pnand %p1541_p13, %p1538_p12 }
  0x5d   :  { %1546 = shalt.err (!%p1543_p0)
}
  0x5e   :  { %s1547_s2 = scalar_lea.vmem %s68_s15, 16  ;;  %s1551_s20 = scalar_lea.vmem %s68_s15, 32 }
  0x5f   :  { %p1548_p1 = scmp.ne.s32.totalorder %s68_s15, %s1547_s2  ;;  %p1552_p2 = scmp.lt.s32.totalorder %s68_s15, %s68_s15 }
  0x60   :  { %p1553_p3 = scmp.lt.s32.totalorder %s1551_s20, %s1547_s2 }
  0x62   :  { %p1554_p4 = por %p1553_p3, %p1552_p2 }
  0x64   :  { %p1555_p5 = pnand %p1554_p4, %p1548_p1 }
  0x66   :  { %1558 = shalt.err (!%p1555_p5)
}
  0x67   :  { %70 = dma.hbm_to_vmem [thread:$0]  %s1803_s4, 16, %s68_s15, [#allocation9]  }
  0x68   :  { %s1559_s18 = scalar_lea.hbm %s1805_s6, 16 }
  0x69   :  { %p1560_p6 = scmp.ne.s32.totalorder %s1805_s6, %s1559_s18  ;;  %p1563_p7 = scmp.lt.u32.totalorder %s1559_s18, %s1805_s6 }
  0x6b   :  { %p1565_p8 = pnand %p1563_p7, %p1560_p6 }
  0x6d   :  { %1568 = shalt.err (!%p1565_p8)
}
  0x6e   :  { %s1569_s8 = scalar_lea.vmem %s90_s17, 16  ;;  %s1573_s9 = scalar_lea.vmem %s90_s17, 32 }
  0x6f   :  { %p1570_p9 = scmp.ne.s32.totalorder %s90_s17, %s1569_s8  ;;  %p1574_p10 = scmp.lt.s32.totalorder %s90_s17, %s90_s17 }
  0x70   :  { %p1575_p11 = scmp.lt.s32.totalorder %s1573_s9, %s1569_s8 }
  0x72   :  { %p1576_p12 = por %p1575_p11, %p1574_p10 }
  0x74   :  { %p1577_p13 = pnand %p1576_p12, %p1570_p9 }
  0x76   :  { %1580 = shalt.err (!%p1577_p13)
}
  0x77   :  { %92 = dma.hbm_to_vmem [thread:$0]  %s1805_s6, 16, %s90_s17, [#allocation12]  }
  0x78   :  { %1603 = dma.done.wait [#allocation3], 256  }
  0x79   :  { %1604 = vsyncadd [#allocation3], 4294967040 }
  0x7a   :  { %1605 = dma.done.wait [#allocation6], 8208  }
  0x7b   :  { %1606 = vsyncadd [#allocation6], 4294959088 }
  0x7c   :  { %1607 = dma.done.wait [#allocation9], 1040  }
  0x7d   :  { %1608 = vsyncadd [#allocation9], 4294966256 }
  0x7e   :  { %1609 = dma.done.wait [#allocation12], 1040  }
  0x7f   :  { %1610 = vsyncadd [#allocation12], 4294966256  ;;  %v1341_v0 = vld [vmem:[#allocation5 + $0x40] sm:$0xff]   ;;  %v1345_v4 = vld [vmem:[#allocation5 + $0x48] sm:$0xff]   ;;  %v1622_v22 = vmov 1983009808   ;;  %v123_v24 = vlaneseq }
  0x80   :  { %v1342_v1 = vld [vmem:[#allocation5 + $0xc0] sm:$0xff]   ;;  %1182 = vmatprep.subr.bf16.mxu0 %v1341_v0  ;;  %v1346_v5 = vld [vmem:[#allocation5 + $0xc8] sm:$0xff]   ;;  %v1349_v8 = vld [vmem:[#allocation5 + $0x50] sm:$0xff]   ;;  %v121_v23 = vunpack.c.l.s4 %v1622_v22  ;;  %vm1624_vm0 = vmmov 0   ;;  %s1625_s6 = smov [#allocation14]   ;;  %vm1081_vm3 = vcmask 1024  }
  0x81   :  { %v1343_v2 = vld [vmem:[#allocation5] sm:$0xff]   ;;  %1204 = vmatprep.subr.bf16.mxu1 %v1342_v1  ;;  %v1347_v6 = vld [vmem:[#allocation5 + $0x8] sm:$0xff]   ;;  %v1350_v9 = vld [vmem:[#allocation5 + $0xd0] sm:$0xff]   ;;  %v1759_v30 = vshrl.u32 %v123_v24, 7  ;;  %s1089_s13 = sshll.u32 %s1625_s6, 4  ;;  %s1090_s13 = int_to_ptr.vmem [resolvable:$true] %s1089_s13 }
  0x82   :  { %v1344_v3 = vld [vmem:[#allocation5 + $0x80] sm:$0xff]   ;;  %1183 = vmatpush3.bf16.msra.mxu0 %v1343_v2  ;;  %v1348_v7 = vld [vmem:[#allocation5 + $0x88] sm:$0xff]   ;;  %v1351_v10 = vld [vmem:[#allocation5 + $0x10] sm:$0xff]   ;;  %v122_v29 = vunpack.c.0.s8 %v121_v23  ;;  %s1581_s0 = scalar_lea.vmem %s1090_s13, 32  ;;  %p1586_p1 = scmp.lt.s32.totalorder %s1090_s13, %s1090_s13 }
  0x83   :  { %1205 = vmatpush3.bf16.msra.mxu1 %v1344_v3  ;;  %1184 = vmatprep.subr.bf16.mxu0 %v1345_v4  ;;  %v1352_v11 = vld [vmem:[#allocation5 + $0x90] sm:$0xff]   ;;  %v1353_v12 = vld [vmem:[#allocation5 + $0x58] sm:$0xff]   ;;  %v1357_v16 = vld [vmem:[#allocation5 + $0x60] sm:$0xff]   ;;  %p1582_p0 = scmp.ne.s32.totalorder %s1090_s13, %s1581_s0  ;;  %p1587_p2 = scmp.lt.s32.totalorder %s1581_s0, %s1581_s0 }
  0x84   :  { %1206 = vmatprep.subr.bf16.mxu1 %v1346_v5  ;;  %v1354_v13 = vld [vmem:[#allocation5 + $0xd8] sm:$0xff]   ;;  %v1358_v17 = vld [vmem:[#allocation5 + $0xe0] sm:$0xff]   ;;  %v1361_v20 = vld [vmem:[#allocation5 + $0x68] sm:$0xff]   ;;  %v1762_v35 = vsub.s32 %v122_v29, %v1759_v30 }
  0x85   :  { %v1355_v14 = vld [vmem:[#allocation5 + $0x18] sm:$0xff]   ;;  %v1359_v18 = vld [vmem:[#allocation5 + $0x20] sm:$0xff]   ;;  %v1362_v21 = vld [vmem:[#allocation5 + $0xe8] sm:$0xff]   ;;  %p1588_p3 = por %p1587_p2, %p1586_p1 }
  0x86   :  { %1185 = vmatpush3.bf16.msra.mxu0 %v1347_v6  ;;  %v1356_v15 = vld [vmem:[#allocation5 + $0x98] sm:$0xff]   ;;  %v1360_v19 = vld [vmem:[#allocation5 + $0xa0] sm:$0xff]   ;;  %v1363_v25 = vld [vmem:[#allocation5 + $0x28] sm:$0xff]  }
  0x87   :  { %1207 = vmatpush3.bf16.msra.mxu1 %v1348_v7  ;;  %1186 = vmatprep.subr.bf16.mxu0 %v1349_v8  ;;  %v1364_v26 = vld [vmem:[#allocation5 + $0xa8] sm:$0xff]   ;;  %v1365_v27 = vld [vmem:[#allocation5 + $0x70] sm:$0xff]   ;;  %v1369_v33 = vld [vmem:[#allocation5 + $0x78] sm:$0xff]   ;;  %p1589_p4 = pnand %p1588_p3, %p1582_p0 }
  0x88   :  { %1208 = vmatprep.subr.bf16.mxu1 %v1350_v9  ;;  %v1366_v28 = vld [vmem:[#allocation5 + $0xf0] sm:$0xff]   ;;  %v1370_v34 = vld [vmem:[#allocation5 + $0xf8] sm:$0xff]   ;;  %v1374_v41 = vld [vmem:[#allocation5 + $0x140] sm:$0xff]  }
  0x89   :  { %v1367_v31 = vld [vmem:[#allocation5 + $0x30] sm:$0xff]   ;;  %v1371_v36 = vld [vmem:[#allocation5 + $0x38] sm:$0xff]   ;;  %v1375_v42 = vld [vmem:[#allocation5 + $0x1c0] sm:$0xff]  }
  0x8a   :  { %1187 = vmatpush3.bf16.msra.mxu0 %v1351_v10  ;;  %v1368_v32 = vld [vmem:[#allocation5 + $0xb0] sm:$0xff]   ;;  %v1372_v37 = vld [vmem:[#allocation5 + $0xb8] sm:$0xff]   ;;  %v1376_v46 = vld [vmem:[#allocation5 + $0x100] sm:$0xff]  }
  0x8b   :  { %1209 = vmatpush3.bf16.msra.mxu1 %v1352_v11  ;;  %1188 = vmatprep.subr.bf16.mxu0 %v1353_v12  ;;  %v115_v38 = vld [vmem:[#allocation2] sm:$0xff]  ;;  %v1377_v49 = vld [vmem:[#allocation5 + $0x180] sm:$0xff]   ;;  %v1378_v51 = vld [vmem:[#allocation5 + $0x148] sm:$0xff]  }
  0x8c   :  { %1210 = vmatprep.subr.bf16.mxu1 %v1354_v13  ;;  %v126_v39 = vrot.slane %v115_v38, %v1762_v35  ;;  %v119_v40 = vcombine.high %v115_v38, %v115_v38  ;;  %v1379_v53 = vld [vmem:[#allocation5 + $0x1c8] sm:$0xff]   ;;  %v1382_v56 = vld [vmem:[#allocation5 + $0x150] sm:$0xff]   ;;  %v1386_v60 = vld [vmem:[#allocation5 + $0x158] sm:$0xff]  }
  0x8d   :  { %v1380_v54 = vld [vmem:[#allocation5 + $0x108] sm:$0xff]   ;;  %v1383_v57 = vld [vmem:[#allocation5 + $0x1d0] sm:$0xff]   ;;  %v1387_v61 = vld [vmem:[#allocation5 + $0x1d8] sm:$0xff]  }
  0x8e   :  { %1189 = vmatpush3.bf16.msra.mxu0 %v1355_v14  ;;  %v134_v43 = vcombine.high %v126_v39, %v126_v39  ;;  %v133_v44 = vrot.slane %v119_v40, %v1762_v35  ;;  %v161_v45 = vpack.c.bf16 %v126_v39, %v126_v39  ;;  %v1381_v55 = vld [vmem:[#allocation5 + $0x188] sm:$0xff]   ;;  %v1384_v58 = vld [vmem:[#allocation5 + $0x110] sm:$0xff]   ;;  %v1388_v62 = vld [vmem:[#allocation5 + $0x118] sm:$0xff]  }
  0x8f   :  { %1211 = vmatpush3.bf16.msra.mxu1 %v1356_v15  ;;  %1190 = vmatprep.subr.bf16.mxu0 %v1357_v16  ;;  %v1385_v59 = vld [vmem:[#allocation5 + $0x190] sm:$0xff]   ;;  %v1389_v63 = vld [vmem:[#allocation5 + $0x198] sm:$0xff]   ;;  %v1390_v0 = vld [vmem:[#allocation5 + $0x160] sm:$0xff]  }
  0x90   :  { %1212 = vmatprep.subr.bf16.mxu1 %v1358_v17  ;;  %v162_v47 = vpack.c.bf16 %v134_v43, %v134_v43  ;;  %v135_v48 = vcombine.high %v133_v44, %v133_v44  ;;  %v163_v50 = vpack.c.bf16 %v133_v44, %v133_v44  ;;  %v1391_v1 = vld [vmem:[#allocation5 + $0x1e0] sm:$0xff]   ;;  %v1394_v4 = vld [vmem:[#allocation5 + $0x168] sm:$0xff]   ;;  %v1398_v8 = vld [vmem:[#allocation5 + $0x170] sm:$0xff]   ;;  %v301_v44 = vsub.s32 0, %v1759_v30 }
  0x91   :  { %v1392_v2 = vld [vmem:[#allocation5 + $0x120] sm:$0xff]   ;;  %v1395_v5 = vld [vmem:[#allocation5 + $0x1e8] sm:$0xff]   ;;  %v1399_v9 = vld [vmem:[#allocation5 + $0x1f0] sm:$0xff]  }
  0x92   :  { %1191 = vmatpush3.bf16.msra.mxu0 %v1359_v18  ;;  %719 = vmatprep.mubr.bf16.mxu0 %v162_v47  ;;  %v164_v52 = vpack.c.bf16 %v135_v48, %v135_v48  ;;  %v1393_v3 = vld [vmem:[#allocation5 + $0x1a0] sm:$0xff]   ;;  %v1396_v6 = vld [vmem:[#allocation5 + $0x128] sm:$0xff]   ;;  %v1400_v10 = vld [vmem:[#allocation5 + $0x130] sm:$0xff]  }
  0x93   :  { %1213 = vmatpush3.bf16.msra.mxu1 %v1360_v19  ;;  %1192 = vmatprep.subr.bf16.mxu0 %v1361_v20  ;;  %v1397_v7 = vld [vmem:[#allocation5 + $0x1a8] sm:$0xff]   ;;  %v1401_v11 = vld [vmem:[#allocation5 + $0x1b0] sm:$0xff]   ;;  %v1402_v12 = vld [vmem:[#allocation5 + $0x178] sm:$0xff]  }
  0x94   :  { %1214 = vmatprep.subr.bf16.mxu1 %v1362_v21  ;;  %759 = vmatprep.mubr.bf16.mxu1 %v164_v52  ;;  %v1403_v13 = vld [vmem:[#allocation5 + $0x1f8] sm:$0xff]   ;;  %v1419_v40 = vld [vmem:[#allocation11 + $0x20] sm:$0xff]  }
  0x95   :  { %v1404_v14 = vld [vmem:[#allocation5 + $0x138] sm:$0xff]  }
  0x96   :  { %1193 = vmatpush3.bf16.msra.mxu0 %v1363_v25  ;;  %v116_v15 = vld [vmem:[#allocation2 + $0x8] sm:$0xff] }
  0x97   :  { %1215 = vmatpush3.bf16.msra.mxu1 %v1364_v26  ;;  %1194 = vmatprep.subr.bf16.mxu0 %v1365_v27  ;;  %v1405_v16 = vld [vmem:[#allocation5 + $0x1b8] sm:$0xff]   ;;  %v143_v17 = vrot.slane %v116_v15, %v1762_v35  ;;  %v136_v18 = vcombine.high %v116_v15, %v116_v15  ;;  %v1407_v26 = vld [vmem:[#allocation8] sm:$0xff]   ;;  %v1623_v27 = vmov 0.0  }
  0x98   :  { %1216 = vmatprep.subr.bf16.mxu1 %v1366_v28  ;;  %v1408_v28 = vld [vmem:[#allocation8 + $0x8] sm:$0xff]   ;;  %v1409_v29 = vld [vmem:[#allocation8 + $0x10] sm:$0xff]   ;;  %v1418_v39 = vld [vmem:[#allocation11 + $0x18] sm:$0xff]  }
  0x99   :  { %v151_v19 = vcombine.high %v143_v17, %v143_v17  ;;  %v150_v20 = vrot.slane %v136_v18, %v1762_v35  ;;  %v165_v21 = vpack.c.bf16 %v143_v17, %v143_v17  ;;  %v1414_v35 = vld [vmem:[#allocation8 + $0x38] sm:$0xff]  }
  0x9a   :  { %1195 = vmatpush3.bf16.msra.mxu0 %v1367_v31  ;;  %v1410_v31 = vld [vmem:[#allocation8 + $0x18] sm:$0xff]  }
  0x9b   :  { %1217 = vmatpush3.bf16.msra.mxu1 %v1368_v32  ;;  %1196 = vmatprep.subr.bf16.mxu0 %v1369_v33  ;;  %v166_v22 = vpack.c.bf16 %v151_v19, %v151_v19  ;;  %v152_v23 = vcombine.high %v150_v20, %v150_v20  ;;  %v167_v24 = vpack.c.bf16 %v150_v20, %v150_v20  ;;  %v1411_v32 = vld [vmem:[#allocation8 + $0x20] sm:$0xff]   ;;  %v1412_v33 = vld [vmem:[#allocation8 + $0x28] sm:$0xff]   ;;  %v1417_v38 = vld [vmem:[#allocation11 + $0x10] sm:$0xff]  }
  0x9c   :  { %1218 = vmatprep.subr.bf16.mxu1 %v1370_v34  ;;  %v1413_v34 = vld [vmem:[#allocation8 + $0x30] sm:$0xff]  }
  0x9d   :  { %v168_v25 = vpack.c.bf16 %v152_v23, %v152_v23 }
  0x9e   :  { %1197 = vmatpush3.bf16.msra.mxu0 %v1371_v36  ;;  %v1415_v36 = vld [vmem:[#allocation11] sm:$0xff]  }
  0x9f   :  { %1219 = vmatpush3.bf16.msra.mxu1 %v1372_v37  ;;  %1226 = vmatprep.subr.bf16.mxu0 %v1374_v41  ;;  %v1416_v37 = vld [vmem:[#allocation11 + $0x8] sm:$0xff]  }
  0xa0   :  { %1248 = vmatprep.subr.bf16.mxu1 %v1375_v42  ;;  %v1420_v41 = vld [vmem:[#allocation11 + $0x28] sm:$0xff]   ;;  %v297_v42 = vld [vmem:[#allocation7] sm:$0x1] }
  0xa1   :  { %720 = vmatmul.mubr.bf16.vlgmr.msra.gmra.mrb[0].mxu0 %v161_v45  ;;  %v298_v43 = vunpack.c.l.bf16 %v297_v42 }
  0xa2   :  { %1227 = vmatpush3.bf16.msra.mxu0 %v1376_v46  ;;  %760 = vmatmul.mubr.bf16.vlgmr.msra.gmra.mrb[0].mxu1 %v163_v50 }
  0xa3   :  { %1228 = vmatprep.subr.bf16.mxu0 %v1378_v51  ;;  %1249 = vmatpush3.bf16.msra.mxu1 %v1377_v49  ;;  %v302_v46 = vrot.slane %v298_v43, %v301_v44 }
  0xa4   :  { %1250 = vmatprep.subr.bf16.mxu1 %v1379_v53  ;;  %799 = vmatprep.mubr.bf16.mxu0 %v166_v22 }
  0xa5   :  { %839 = vmatprep.mubr.bf16.mxu1 %v168_v25 }
  0xa6   :  { %1229 = vmatpush3.bf16.msra.mxu0 %v1380_v54 }
  0xa7   :  { %1230 = vmatprep.subr.bf16.mxu0 %v1382_v56  ;;  %1251 = vmatpush3.bf16.msra.mxu1 %v1381_v55 }
  0xa8   :  { %1252 = vmatprep.subr.bf16.mxu1 %v1383_v57 }
  0xaa   :  { %1231 = vmatpush3.bf16.msra.mxu0 %v1384_v58 }
  0xab   :  { %1232 = vmatprep.subr.bf16.mxu0 %v1386_v60  ;;  %1253 = vmatpush3.bf16.msra.mxu1 %v1385_v59 }
  0xac   :  { %1254 = vmatprep.subr.bf16.mxu1 %v1387_v61 }
  0xae   :  { %1233 = vmatpush3.bf16.msra.mxu0 %v1388_v62 }
  0xaf   :  { %1234 = vmatprep.subr.bf16.mxu0 %v1390_v0  ;;  %1255 = vmatpush3.bf16.msra.mxu1 %v1389_v63 }
  0xb0   :  { %1256 = vmatprep.subr.bf16.mxu1 %v1391_v1 }
  0xb2   :  { %1235 = vmatpush3.bf16.msra.mxu0 %v1392_v2 }
  0xb3   :  { %1236 = vmatprep.subr.bf16.mxu0 %v1394_v4  ;;  %1257 = vmatpush3.bf16.msra.mxu1 %v1393_v3 }
  0xb4   :  { %1258 = vmatprep.subr.bf16.mxu1 %v1395_v5 }
  0xb6   :  { %1237 = vmatpush3.bf16.msra.mxu0 %v1396_v6 }
  0xb7   :  { %1238 = vmatprep.subr.bf16.mxu0 %v1398_v8  ;;  %1259 = vmatpush3.bf16.msra.mxu1 %v1397_v7  ;;  %v1421_v8 = vld [vmem:[#allocation11 + $0x30] sm:$0xff]  }
  0xb8   :  { %1260 = vmatprep.subr.bf16.mxu1 %v1399_v9  ;;  %v1422_v9 = vld [vmem:[#allocation11 + $0x38] sm:$0xff]  }
  0xba   :  { %1239 = vmatpush3.bf16.msra.mxu0 %v1400_v10  ;;  %v867_v10 = vld [vmem:[#allocation10] sm:$0x1] }
  0xbb   :  { %1240 = vmatprep.subr.bf16.mxu0 %v1402_v12  ;;  %1261 = vmatpush3.bf16.msra.mxu1 %v1401_v11  ;;  %v868_v11 = vunpack.c.l.bf16 %v867_v10 }
  0xbc   :  { %1262 = vmatprep.subr.bf16.mxu1 %v1403_v13 }
  0xbd   :  { %v872_v12 = vrot.slane %v868_v11, %v301_v44 }
  0xbe   :  { %1241 = vmatpush3.bf16.msra.mxu0 %v1404_v14 }
  0xbf   :  { %1263 = vmatpush3.bf16.msra.mxu1 %v1405_v16  ;;  %1288 = vmatprep.subr.bf16.mxu0 %v1623_v27 }
  0xc0   :  { %1308 = vmatprep.subr.bf16.mxu1 %v1623_v27 }
  0xc1   :  { %800 = vmatmul.mubr.bf16.vlgmr.msra.gmra.mrb[4].mxu0 %v165_v21  ;;  %v981_v21 = vld [vmem:[#allocation13] sm:$0x1] }
  0xc2   :  { %840 = vmatmul.mubr.bf16.vlgmr.msra.gmra.mrb[4].mxu1 %v167_v24  ;;  %1289 = vmatpush3.bf16.msra.mxu0 %v1407_v26  ;;  %v982_v22 = vunpack.c.l.bf16 %v981_v21 }
  0xc3   :  { %1290 = vmatprep.subr.bf16.mxu0 %v1623_v27  ;;  %1304 = vmatprep.mubr.msk.bf16.mxu0 %vm1624_vm0, %v1623_v27 }
  0xc4   :  { %1324 = vmatprep.mubr.msk.bf16.mxu1 %vm1624_vm0, %v1623_v27  ;;  %1309 = vmatpush3.bf16.msra.mxu1 %v1415_v36  ;;  %v986_v23 = vrot.slane %v982_v22, %v301_v44 }
  0xc5   :  { %1310 = vmatprep.subr.bf16.mxu1 %v1623_v27 }
  0xc6   :  { %1291 = vmatpush3.bf16.msra.mxu0 %v1408_v28 }
  0xc7   :  { %1292 = vmatprep.subr.bf16.mxu0 %v1623_v27 }
  0xc8   :  { %1311 = vmatpush3.bf16.msra.mxu1 %v1416_v37 }
  0xc9   :  { %1312 = vmatprep.subr.bf16.mxu1 %v1623_v27 }
  0xca   :  { %1293 = vmatpush3.bf16.msra.mxu0 %v1409_v29 }
  0xcb   :  { %1294 = vmatprep.subr.bf16.mxu0 %v1623_v27 }
  0xcc   :  { %1313 = vmatpush3.bf16.msra.mxu1 %v1417_v38 }
  0xcd   :  { %1314 = vmatprep.subr.bf16.mxu1 %v1623_v27 }
  0xce   :  { %1295 = vmatpush3.bf16.msra.mxu0 %v1410_v31 }
  0xcf   :  { %1296 = vmatprep.subr.bf16.mxu0 %v1623_v27 }
  0xd0   :  { %1315 = vmatpush3.bf16.msra.mxu1 %v1418_v39 }
  0xd1   :  { %1316 = vmatprep.subr.bf16.mxu1 %v1623_v27 }
  0xd2   :  { %1297 = vmatpush3.bf16.msra.mxu0 %v1411_v32 }
  0xd3   :  { %1298 = vmatprep.subr.bf16.mxu0 %v1623_v27 }
  0xd4   :  { %1317 = vmatpush3.bf16.msra.mxu1 %v1419_v40 }
  0xd5   :  { %1318 = vmatprep.subr.bf16.mxu1 %v1623_v27 }
  0xd6   :  { %1299 = vmatpush3.bf16.msra.mxu0 %v1412_v33 }
  0xd7   :  { %1300 = vmatprep.subr.bf16.mxu0 %v1623_v27 }
  0xd8   :  { %1319 = vmatpush3.bf16.msra.mxu1 %v1420_v41 }
  0xd9   :  { %1320 = vmatprep.subr.bf16.mxu1 %v1623_v27 }
  0xda   :  { %1301 = vmatpush3.bf16.msra.mxu0 %v1413_v34 }
  0xdb   :  { %1302 = vmatprep.subr.bf16.mxu0 %v1623_v27 }
  0xdc   :  { %1321 = vmatpush3.bf16.msra.mxu1 %v1421_v8 }
  0xdd   :  { %1322 = vmatprep.subr.bf16.mxu1 %v1623_v27 }
  0xde   :  { %1303 = vmatpush3.bf16.msra.mxu0 %v1414_v35 }
  0xe0   :  { %1323 = vmatpush3.bf16.msra.mxu1 %v1422_v9 }
 0x174   :  { %v1198_v45 = vpop.f32.mrb[0].mxu0 }
 0x175   :  { %v1199_v47 = vpop.f32.mrb[1].mxu0  ;;  %v1220_v48 = vpop.f32.mrb[0].mxu1 }
 0x176   :  { %v1200_v49 = vadd.f32 %v1199_v47, %v1198_v45  ;;  %v1201_v50 = vpop.f32.mrb[2].mxu0  ;;  %v1221_v51 = vpop.f32.mrb[1].mxu1 }
 0x177   :  { %v1202_v52 = vpop.f32.mrb[3].mxu0  ;;  %v1222_v54 = vadd.f32 %v1221_v51, %v1220_v48  ;;  %v1223_v55 = vpop.f32.mrb[2].mxu1 }
 0x178   :  { %v722_v53 = vadd.f32 %v1200_v49, %v302_v46  ;;  %v1224_v56 = vpop.f32.mrb[3].mxu1 }
 0x17a   :  { %v762_v57 = vadd.f32 %v1222_v54, %v722_v53 }
 0x194   :  { %v1242_v58 = vpop.f32.mrb[4].mxu0 }
 0x195   :  { %v1243_v59 = vpop.f32.mrb[5].mxu0  ;;  %v1264_v60 = vpop.f32.mrb[4].mxu1 }
 0x196   :  { %v1244_v61 = vadd.f32 %v1243_v59, %v1242_v58  ;;  %v1245_v62 = vpop.f32.mrb[6].mxu0  ;;  %v1265_v63 = vpop.f32.mrb[5].mxu1 }
 0x197   :  { %v1246_v30 = vpop.f32.mrb[7].mxu0  ;;  %v1266_v1 = vadd.f32 %v1265_v63, %v1264_v60  ;;  %v1267_v2 = vpop.f32.mrb[6].mxu1 }
 0x198   :  { %v802_v0 = vadd.f32 %v1244_v61, %v762_v57  ;;  %v1268_v3 = vpop.f32.mrb[7].mxu1 }
 0x19a   :  { %v842_v4 = vadd.f32 %v1266_v1, %v802_v0 }
 0x19c   :  { %vm847_vm1 = vcmp.ge.f32.partialorder %v842_v4, 0.0  ;;  %v848_v5 = vmul.f32 0.2, %v842_v4 }
 0x19e   :  { %v849_v6 = vsel %vm847_vm1, %v842_v4, %v848_v5 }
 0x19f   :  { %v850_v7 = vpack.c.bf16 %v849_v6, %v849_v6 }
 0x1a1   :  { %1305 = vmatmul.mubr.bf16.vlgmr.msra.gmra.mrb[8].mxu0 %v850_v7 }
 0x274   :  { %v955_v13 = vpop.f32.mrb[8].mxu0 }
 0x275   :  { %v956_v14 = vadd.f32 %v955_v13, %v872_v12  ;;  %v1306_v15 = vpop.f32.mrb[9].mxu0 }
 0x276   :  { %v958_v16 = vpop.f32.mrb[10].mxu0 }
 0x277   :  { %vm961_vm2 = vcmp.ge.f32.partialorder %v956_v14, 0.0  ;;  %v962_v17 = vmul.f32 0.2, %v956_v14  ;;  %v1307_v18 = vpop.f32.mrb[11].mxu0 }
 0x279   :  { %v963_v19 = vsel %vm961_vm2, %v956_v14, %v962_v17 }
 0x27a   :  { %v964_v20 = vpack.c.bf16 %v963_v19, %v963_v19 }
 0x27c   :  { %1325 = vmatmul.mubr.bf16.vlgmr.msra.gmra.mrb[8].mxu1 %v964_v20 }
 0x34f   :  { %v1069_v24 = vpop.f32.mrb[8].mxu1 }
 0x350   :  { %v1070_v25 = vadd.f32 %v1069_v24, %v986_v23  ;;  %v1326_v26 = vpop.f32.mrb[9].mxu1 }
 0x351   :  { %v1072_v27 = vpop.f32.mrb[10].mxu1 }
 0x352   :  { %v1181_v28 = vmul.f32 -1.442695, %v1070_v25  ;;  %v1327_v29 = vpop.f32.mrb[11].mxu1 }
 0x354   :  { %1423 = vpow2.f32 %v1181_v28 }
 0x35e   :  { %v1424_v31 = vpop.eup %1423 }
 0x35f   :  { %v1078_v32 = vadd.f32 1.0, %v1424_v31 }
 0x361   :  { %1425 = vrcp.f32 %v1078_v32 }
 0x36b   :  { %v1426_v33 = vpop.eup %1425 }
 0x36c   :  { %1082 = vst.msk [vmem:[#allocation14] sm:$0x3] %vm1081_vm3, %v1426_v33 }
 0x36d   :  { %1592 = shalt.err (!%p1589_p4)
}
 0x36e   :  { %s1593_s15 = scalar_lea.hbm %s1806_s7, 32 }
 0x36f   :  { %p1594_p5 = scmp.ne.s32.totalorder %s1806_s7, %s1593_s15  ;;  %p1597_p6 = scmp.lt.u32.totalorder %s1593_s15, %s1806_s7 }
 0x371   :  { %p1599_p7 = pnand %p1597_p6, %p1594_p5 }
 0x373   :  { %1602 = shalt.err (!%p1599_p7)
}
 0x374   :  { %1092 = dma.vmem_to_hbm [thread:$0]  %s1090_s13, 32, %s1806_s7, [#allocation4]  }
 0x375   :  { %1611 = dma.done.wait [#allocation4], 32  }
 0x376   :  { %1612 = vsyncadd [#allocation4], 4294967264 }
 0x377   :  { %1096 = vsyncpa [#allocation3], 1 }
 0x378   :  { %1097 = vsyncpa [#allocation6], 1 }
 0x379   :  { %1098 = vsyncpa [#allocation9], 1 }
 0x37a   :  { %1099 = vsyncpa [#allocation12], 1 }
 0x37b   :  { %1100 = vsyncpa [#allocation4], 1 }

</bundles_post_ra>
